<compile_context>
chip_gen: v6e
topology: v6e:2x2x1
jax: 0.10.0
libtpu: 0.0.40
codegen_flags: <defaults>
</compile_context>

<pallas_src>
import functools

import numpy as np
import jax
import jax.numpy as jnp
from jax.experimental import pallas as pl
from jax.experimental.pallas import tpu as pltpu

_LANE = 128


def _round_up(n, m):
    return ((n + m - 1) // m) * m


def _max_identity(dtype):
    """Identity element for max in `dtype` (fp8-safe: no -inf for inf-less types)."""
    dtype = jnp.dtype(dtype)
    if jnp.issubdtype(dtype, jnp.floating):
        has_inf = True
        try:
            has_inf = bool(np.isinf(
                np.asarray(-np.inf, dtype=np.float64).astype(dtype).astype(np.float64)))
        except Exception:
            pass
        if has_inf:
            return jnp.array(-jnp.inf, dtype)
        return jnp.array(jnp.finfo(dtype).min, dtype)
    if jnp.issubdtype(dtype, jnp.integer):
        return jnp.array(jnp.iinfo(dtype).min, dtype)
    return jnp.array(False, dtype)


def _default_block_bytes():
    """Per-input-block streaming budget (Pallas double-buffers it)."""
    try:
        info = pltpu.get_tpu_info()
        vmem = int(getattr(info, "vmem_capacity_bytes", 0) or 0)
        # v7x: 64 MiB VMEM/TC, ~3.2 TB/s HBM -> bigger blocks to amortize the
        # ~0.35us grid-step overhead; 2 x 8 MiB stays inside the 32 MiB scoped
        # default.
        if 0 < vmem <= 64 * 1024 * 1024:
            return 8 * 1024 * 1024
    except Exception:
        pass
    # v5e / v6e (or unknown): 2 x 4 MiB is already ~roofline and sits well
    # inside v5e's 16 MiB scoped-VMEM default.
    return 4 * 1024 * 1024


def _gmp_kernel(x_ref, o_ref, *, valid_rows, fold, h_out):
    """Max over the (tiled) row axis; accumulates directly into o_ref."""
    k = pl.program_id(1)
    ident = _max_identity(o_ref.dtype)

    @pl.when(k == 0)
    def _init():
        o_ref[...] = jnp.full(o_ref.shape, ident, o_ref.dtype)

    st = x_ref.shape[1]

    def update(x):
        m = jnp.max(x, axis=1)                           # (bt, hw)
        if fold > 1:
            # hw == 128 == fold * h_out: combine the `fold` lane groups with
            # log2(fold) XLU rolls (free slot vs. the VPU/DMA).
            shift = m.shape[-1] // 2
            while shift >= h_out:
                m = jnp.maximum(m, pltpu.roll(m, shift, axis=1))
                shift //= 2
            m = m[:, :h_out]
        o_ref[...] = jnp.maximum(o_ref[...], m)

    if valid_rows % st == 0:
        update(x_ref[...])
    else:
        last = pl.num_programs(1) - 1

        @pl.when(k != last)
        def _full_tile():
            update(x_ref[...])

        @pl.when(k == last)
        def _ragged_tile():
            x = x_ref[...]
            row = k * st + jax.lax.broadcasted_iota(jnp.int32, x.shape, 1)
            update(jnp.where(row < valid_rows, x, ident))


def global_max_pool1d(x, *, bt=None, st=None, target_block_bytes=None):
    """Max over axis 1 of a (B, S, H) array (== torch.max(x, dim=1).values)."""
    B, S, H = x.shape
    dtype = x.dtype
    itemsize = jnp.dtype(dtype).itemsize
    if target_block_bytes is None:
        target_block_bytes = _default_block_bytes()

    # ---- lane-dense layout for narrow H (H | 128): work on 128-lane rows.
    fold = 1
    if H < _LANE and _LANE % H == 0 and S % (_LANE // H) == 0:
        fold = _LANE // H
    rows = S // fold                      # reduction length in the work layout
    hw = H * fold                         # work-layout row width (128 if folded)
    xw = x.reshape(B, rows, hw) if fold > 1 else x

    sub = max(8, 32 // itemsize)          # packed-sublane rows for this dtype
    row_bytes = _round_up(hw, _LANE) * itemsize
    slab_bytes = _round_up(rows, sub) * row_bytes   # one batch row, full sequence

    # ---- batch tile first: multiple of 8 (or the full batch) so output
    #      blocks stay sublane-legal; never lets the block exceed the budget
    #      because st is derived from what remains afterwards.
    if bt is None:
        if B <= 8:
            bt = B
        else:
            n = target_block_bytes // slab_bytes if slab_bytes <= target_block_bytes else 0
            bt = min(B, (n // 8) * 8) if n >= 8 else 8
        # v7x has 2 TensorCores: give the "parallel" batch axis >= 2 steps
        # whenever alignment allows (B >= 16).
        if bt >= B and B >= 16:
            bt = min(bt, _round_up(pl.cdiv(B, 2), 8))
    bt = max(1, min(bt, B))

    # ---- sequence tile: as large as the remaining budget allows, rounded to
    #      the dtype's packed-sublane count.
    if st is None:
        budget_rows = max(1, target_block_bytes // (bt * row_bytes))
        if rows <= sub or budget_rows >= rows:
            st = rows
        else:
            # NOTE: floors at `sub`; only pathological H (>~16K) can overshoot
            # the budget here, in which case raise vmem_limit_bytes.
            st = max(sub, (budget_rows // sub) * sub)
    st = max(1, min(st, rows))

    grid = (pl.cdiv(B, bt), pl.cdiv(rows, st))
    kernel = functools.partial(_gmp_kernel, valid_rows=rows, fold=fold, h_out=H)

    return pl.pallas_call(
        kernel,
        out_shape=jax.ShapeDtypeStruct((B, H), dtype),
        grid_spec=pltpu.PrefetchScalarGridSpec(
            num_scalar_prefetch=0,
            grid=grid,
            in_specs=[pl.BlockSpec((bt, st, hw), lambda b, k: (b, k, 0))],
            # k-independent output index -> VMEM-resident accumulator block.
            out_specs=pl.BlockSpec((bt, H), lambda b, k: (b, 0)),
        ),
        compiler_params=pltpu.CompilerParams(
            dimension_semantics=("parallel", "arbitrary"),
        ),
    )(xw)


if __name__ == "__main__":
    key = jax.random.PRNGKey(0)

    # 1) Small shape matching the ConvBERT usage: (batch, seq, hidden).
    #    Exercises the lane-dense fold path (H=32 -> 128-lane rows).
    B, S, H = 2, 8, 32
    x = jax.random.normal(key, (B, S, H), dtype=jnp.float32)
    out = jax.block_until_ready(global_max_pool1d(x))
    ref = jnp.max(x, axis=1)
    assert out.shape == (B, H), out.shape
    assert jnp.array_equal(out, ref), "fp32 folded whole-S path mismatch"

    # 2) bf16, no fold (H=128): multi-step resident accumulator, gated ragged-S
    #    mask, ragged batch tile, dtype-aware (16-row) sequence tiles.
    B2, S2, H2 = 9, 20, 128
    x2 = jax.random.normal(jax.random.PRNGKey(0), (B2, S2, H2), dtype=jnp.bfloat16)
    out2 = jax.block_until_ready(global_max_pool1d(x2, bt=8, st=16))
    ref2 = jnp.max(x2, axis=1)
    assert out2.shape == (B2, H2), out2.shape
    assert jnp.array_equal(out2, ref2), "bf16 tiled/masked path mismatch"

    # 3) fp32, fold + multi-step + ragged folded rows (S*H/128 = 20, st = 8).
    B3, S3, H3 = 2, 80, 32
    x3 = jax.random.normal(jax.random.PRNGKey(0), (B3, S3, H3), dtype=jnp.float32)
    out3 = jax.block_until_ready(global_max_pool1d(x3, st=8))
    ref3 = jnp.max(x3, axis=1)
    assert out3.shape == (B3, H3), out3.shape
    assert jnp.array_equal(out3, ref3), "fp32 folded tiled/masked path mismatch"

    print("KERNEL_OK")
</pallas_src>

<mosaic_0001>
module attributes {stable_mosaic.version = 11 : i64} {
  func.func @_gmp_kernel(%arg0: i32, %arg1: i32, %arg2: memref<2x2x128xf32, #tpu.memory_space<vmem>>, %arg3: memref<2x32xf32, #tpu.memory_space<vmem>>) attributes {dimension_semantics = [#tpu.dimension_semantics<parallel>, #tpu.dimension_semantics<arbitrary>], iteration_bounds = array<i64: 1, 1>, scalar_prefetch = 0 : i64, scratch_operands = 0 : i64, tpu.core_type = #tpu.core_type<tc>, window_params = [{transform_indices = @transform_0, window_bounds = array<i64: 2, 2, 128>}, {transform_indices = @transform_1, window_bounds = array<i64: 2, 32>}]} {
    %c0_i32 = arith.constant 0 : i32
    %0 = arith.cmpi eq, %arg1, %c0_i32 : i32
    %1 = arith.extui %0 : i1 to i32
    %cst = arith.constant 0xFF800000 : f32
    %c0_i32_0 = arith.constant 0 : i32
    %2 = arith.cmpi ne, %1, %c0_i32_0 : i32
    scf.if %2 {
      %13 = vector.broadcast %cst : f32 to vector<2x32xf32>
      %c0_8 = arith.constant 0 : index
      %c0_9 = arith.constant 0 : index
      %14 = vector.load %arg3[%c0_8, %c0_9] : memref<2x32xf32, #tpu.memory_space<vmem>>, vector<2x32xf32>
      tpu.vector_store %arg3[%c0_8, %c0_9], %13 {strides = array<i32>} : memref<2x32xf32, #tpu.memory_space<vmem>>, vector<2x32xf32>,
    } else {
    }
    %c0 = arith.constant 0 : index
    %c0_1 = arith.constant 0 : index
    %c0_2 = arith.constant 0 : index
    %3 = vector.load %arg2[%c0, %c0_1, %c0_2] : memref<2x2x128xf32, #tpu.memory_space<vmem>>, vector<2x2x128xf32>
    %cst_3 = arith.constant dense<0xFF800000> : vector<2x128xf32>
    %4 = vector.multi_reduction <maximumf>, %3, %cst_3 [1] : vector<2x2x128xf32> to vector<2x128xf32>
    %c64_i32 = arith.constant 64 : i32
    %5 = tpu.dynamic_rotate %4 by %c64_i32 dim 1 : vector<2x128xf32>, i32 -> vector<2x128xf32>
    %6 = arith.maximumf %4, %5 : vector<2x128xf32>
    %c32_i32 = arith.constant 32 : i32
    %7 = tpu.dynamic_rotate %6 by %c32_i32 dim 1 : vector<2x128xf32>, i32 -> vector<2x128xf32>
    %8 = arith.maximumf %6, %7 : vector<2x128xf32>
    %9 = vector.extract_strided_slice %8 {offsets = [0, 0], sizes = [2, 32], strides = [1, 1]} : vector<2x128xf32> to vector<2x32xf32>
    %c0_4 = arith.constant 0 : index
    %c0_5 = arith.constant 0 : index
    %10 = vector.load %arg3[%c0_4, %c0_5] : memref<2x32xf32, #tpu.memory_space<vmem>>, vector<2x32xf32>
    %11 = arith.maximumf %10, %9 : vector<2x32xf32>
    %c0_6 = arith.constant 0 : index
    %c0_7 = arith.constant 0 : index
    %12 = vector.load %arg3[%c0_6, %c0_7] : memref<2x32xf32, #tpu.memory_space<vmem>>, vector<2x32xf32>
    tpu.vector_store %arg3[%c0_6, %c0_7], %11 {strides = array<i32>} : memref<2x32xf32, #tpu.memory_space<vmem>>, vector<2x32xf32>,
    return
  }
  func.func @transform_0(%arg0: i32, %arg1: i32) -> (i32, i32, i32) {
    %c0_i32 = arith.constant 0 : i32
    %c0_i32_0 = arith.constant 0 : i32
    return %arg0, %arg1, %c0_i32 : i32, i32, i32
  }
  func.func @transform_1(%arg0: i32, %arg1: i32) -> (i32, i32) {
    %c0_i32 = arith.constant 0 : i32
    %c0_i32_0 = arith.constant 0 : i32
    return %arg0, %c0_i32 : i32, i32
  }
}

</mosaic_0001>

<bundles_post_ra>
// kernel: tpu_custom_call.1
= control target key start
LH: loop header
LB: loop body
LE: loop exit
PB: predicated region body
PF: predicated region fallthrough
CT: control target
= control target key end

     0   :  { %6 = vsyncpa [#allocation3], 0  ;;  %s176_s0 = inlined_call_operand.hbm [shape: f32[2,2,128], index: 0, kind: input, shape index: {}]   ;;  %s177_s1 = inlined_call_operand.hbm [shape: f32[2,32], index: 1, kind: output, shape index: {}]  }
   0x1   :  { %7 = vsyncpa [#allocation4], 0  ;;  %s146_s6 = smov [#allocation2]  }
   0x2   :  { %s13_s7 = sshll.u32 %s146_s6, 4  ;;  %s14_s7 = int_to_ptr.vmem [resolvable:$true] %s13_s7 }
   0x3   :  { %s110_s8 = scalar_lea.vmem %s14_s7, 64  ;;  %p115_p1 = scmp.lt.s32.totalorder %s14_s7, %s14_s7 }
   0x4   :  { %p111_p0 = scmp.ne.s32.totalorder %s14_s7, %s110_s8  ;;  %p116_p2 = scmp.lt.s32.totalorder %s110_s8, %s110_s8 }
   0x6   :  { %p117_p3 = por %p116_p2, %p115_p1 }
   0x8   :  { %p118_p4 = pnand %p117_p3, %p111_p0 }
   0xa   :  { %121 = shalt.err (!%p118_p4)
}
   0xb   :  { %s147_s9 = smov 32   ;;  %s148_s10 = smov 2  }
   0xc   :  { %19 = dma.hbm_to_vmem [thread:$0]  %s176_s0, 64, %s14_s7, [#allocation3], %s147_s9, %s147_s9, %s148_s10  }
   0xd   :  { %142 = dma.done.wait [#allocation3], 64  }
   0xe   :  { %143 = vsyncadd [#allocation3], 4294967232  ;;  %vm27_vm0 = vcmask 254976   ;;  %v149_v0 = vmov -inf   ;;  %vm31_vm1 = vcmask 1041408   ;;  %vm48_vm2 = vcmask 1041409  }
   0xf   :  { %28 = vst.msk [vmem:[#allocation5] sm:$0x3] %vm27_vm0, %v149_v0  ;;  %v29_v1 = vld [vmem:[#allocation2] sm:$0x3]  ;;  %v30_v2 = vld [vmem:[#allocation2 + $0x2] sm:$0x3] }
  0x10   :  { %v32_v3 = vsel %vm31_vm1, %v29_v1, -inf  ;;  %v39_v4 = vsel %vm31_vm1, %v30_v2, -inf  ;;  %s150_s0 = smov 64   ;;  %s151_s13 = smov [#allocation5]  }
  0x11   :  { %v33_v5 = vrot.slane %v32_v3, 4  ;;  %v40_v6 = vrot.slane %v39_v4, 4  ;;  %s87_s14 = sshll.u32 %s151_s13, 4  ;;  %s88_s14 = int_to_ptr.vmem [resolvable:$true] %s87_s14 }
  0x12   :  { %s122_s15 = scalar_lea.vmem %s88_s14, 32  ;;  %p127_p6 = scmp.lt.s32.totalorder %s88_s14, %s88_s14 }
  0x13   :  { %v34_v7 = vmax.f32 %v32_v3, %v33_v5  ;;  %v41_v8 = vmax.f32 %v39_v4, %v40_v6  ;;  %p123_p5 = scmp.ne.s32.totalorder %s88_s14, %s122_s15  ;;  %p128_p7 = scmp.lt.s32.totalorder %s122_s15, %s122_s15 }
  0x15   :  { %v35_v9 = vrot.slane %v34_v7, 2  ;;  %v42_v10 = vrot.slane %v41_v8, 2  ;;  %p129_p8 = por %p128_p7, %p127_p6 }
  0x16   :  { %v72_v28 = vld [vmem:[#allocation5] sm:$0x3] }
  0x17   :  { %v36_v11 = vmax.f32 %v34_v7, %v35_v9  ;;  %v43_v12 = vmax.f32 %v41_v8, %v42_v10  ;;  %p130_p9 = pnand %p129_p8, %p123_p5 }
  0x19   :  { %v37_v13 = vrot.slane %v36_v11, 1  ;;  %v44_v14 = vrot.slane %v43_v12, 1 }
  0x1b   :  { %v38_v15 = vmax.f32 %v36_v11, %v37_v13  ;;  %v45_v16 = vmax.f32 %v43_v12, %v44_v14 }
  0x1d   :  { %v49_v17 = vsel %vm48_vm2, %v45_v16, %v38_v15 }
  0x1e   :  { %51 = vrot.lane.b32.xlu0 %v49_v17, %s150_s0 }
  0x90   :  { %v52_v18 = vpop.permute.xlu0 %51 }
  0x91   :  { %v54_v19 = vrot.slane %v52_v18, 1  ;;  %v57_v21 = vmax.f32 %v38_v15, %v52_v18 }
  0x93   :  { %v58_v20 = vmax.f32 %v45_v16, %v54_v19 }
  0x95   :  { %v61_v22 = vrot.slane %v58_v20, 7 }
  0x97   :  { %v62_v23 = vsel %vm48_vm2, %v61_v22, %v57_v21 }
  0x98   :  { %64 = vrot.lane.b32.xlu0 %v62_v23, %s147_s9 }
 0x10a   :  { %v65_v24 = vpop.permute.xlu0 %64 }
 0x10b   :  { %v67_v25 = vrot.slane %v65_v24, 1  ;;  %v70_v27 = vmax.f32 %v57_v21, %v65_v24 }
 0x10d   :  { %v71_v26 = vmax.f32 %v58_v20, %v67_v25 }
 0x10f   :  { %v75_v29 = vrot.slane %v71_v26, 7 }
 0x111   :  { %v76_v30 = vsel %vm48_vm2, %v75_v29, %v70_v27 }
 0x112   :  { %v78_v31 = vmax.f32 %v72_v28, %v76_v30 }
 0x114   :  { %80 = vst.msk [vmem:[#allocation5] sm:$0x3] %vm27_vm0, %v78_v31 }
 0x115   :  { %133 = shalt.err (!%p130_p9)
}
 0x116   :  { %90 = dma.vmem_to_hbm [thread:$0]  %s88_s14, 32, %s177_s1, [#allocation4]  }
 0x117   :  { %144 = dma.done.wait [#allocation4], 32  }
 0x118   :  { %145 = vsyncadd [#allocation4], 4294967264 }
 0x119   :  { %94 = vsyncpa [#allocation3], 1 }
 0x11a   :  { %95 = vsyncpa [#allocation4], 1 }

</bundles_post_ra>
